<compile_context>
chip_gen: v7x
topology: tpu7x:2x2x1
jax: 0.10.0
libtpu: 0.0.40
codegen_flags: <defaults>
</compile_context>

<pallas_src>
import jax
import jax.numpy as jnp
from jax.experimental import pallas as pl
from jax.experimental.pallas import tpu as pltpu


_LANE = 256     # lanes per packed batch row (multiple of 128)
_CHUNK = 8      # sublane rows per inner-loop step (one (8,128)-aligned tile)


def _mlp_kernel(x_ref, w1_ref, b1_ref, w2_ref, b2_ref, w3_ref, b3_ref, o_ref):
    """Fused MLP on a feature-major, sublane+lane packed batch block.

    x_ref : (2, R, LANE) VMEM   (feature, packed-batch-rows, lanes)
    o_ref : (R, LANE)    VMEM
    w*/b* : SMEM scalars, weights stored (in, out)
    """
    rows = o_ref.shape[0]
    n_chunks = rows // _CHUNK

    # Hoist all 65 scalar (SMEM) loads out of the chunk loop.
    w1 = [[w1_ref[i, j] for j in range(8)] for i in range(2)]
    b1 = [b1_ref[0, j] for j in range(8)]
    w2 = [[w2_ref[i, j] for j in range(4)] for i in range(8)]
    b2 = [b2_ref[0, j] for j in range(4)]
    w3 = [w3_ref[i, 0] for i in range(4)]
    b3 = b3_ref[0, 0]

    def chunk(c, carry):
        r0 = pl.multiple_of(c * _CHUNK, _CHUNK)
        x0 = x_ref[0, pl.ds(r0, _CHUNK), :]            # (CHUNK, LANE) full vregs
        x1 = x_ref[1, pl.ds(r0, _CHUNK), :]

        # fc1: 2 -> 8, ReLU  (scalar-broadcast FMAs on the VPU; no MXU for K=2)
        h1 = [jnp.maximum(w1[0][j] * x0 + w1[1][j] * x1 + b1[j], 0.0)
              for j in range(8)]

        # fc2: 8 -> 4, ReLU
        h2 = []
        for j in range(4):
            v = w2[0][j] * h1[0]
            for k in range(1, 8):
                v = v + w2[k][j] * h1[k]
            h2.append(jnp.maximum(v + b2[j], 0.0))

        # fc3: 4 -> 1, Sigmoid (exp + approx reciprocal on the EUP slot)
        v = w3[0] * h2[0]
        for k in range(1, 4):
            v = v + w3[k] * h2[k]
        v = v + b3
        o_ref[pl.ds(r0, _CHUNK), :] = pl.reciprocal(1.0 + jnp.exp(-v),
                                                    approx=True)
        return carry

    unroll = 4 if n_chunks % 4 == 0 else (2 if n_chunks % 2 == 0 else 1)
    jax.lax.fori_loop(0, n_chunks, chunk, 0, unroll=unroll)


def _round_up(n, m):
    return ((n + m - 1) // m) * m


def compare_nn_forward(x, params, *, rows_per_block=1024):
    """x: [B, 2] float32 (same interface as the torch module). Returns [B, 1]."""
    B, din = x.shape
    assert din == 2

    rows_needed = -(-B // _LANE)                               # cdiv(B, LANE)
    rows_block = min(rows_per_block, _round_up(rows_needed, 8))
    rows_total = _round_up(rows_needed, rows_block)
    b_pad = rows_total * _LANE
    grid = rows_total // rows_block

    w1, b1 = params["w1"], params["b1"]   # (2, 8), (1, 8)
    w2, b2 = params["w2"], params["b2"]   # (8, 4), (1, 4)
    w3, b3 = params["w3"], params["b3"]   # (4, 1), (1, 1)

    # Layout plumbing only: feature-major, batch packed into (rows, lanes).
    xt = jnp.swapaxes(x, 0, 1)                                 # (2, B)
    if b_pad != B:
        xt = jnp.pad(xt, ((0, 0), (0, b_pad - B)))             # zero pad tail
    x3 = xt.reshape(2, rows_total, _LANE)

    smem = pl.BlockSpec(memory_space=pltpu.MemorySpace.SMEM)

    out = pl.pallas_call(
        _mlp_kernel,
        out_shape=jax.ShapeDtypeStruct((rows_total, _LANE), jnp.float32),
        grid=(grid,),
        in_specs=[
            pl.BlockSpec((2, rows_block, _LANE), lambda i: (0, i, 0)),  # x
            smem, smem,                                                 # w1, b1
            smem, smem,                                                 # w2, b2
            smem, smem,                                                 # w3, b3
        ],
        out_specs=pl.BlockSpec((rows_block, _LANE), lambda i: (i, 0)),
        compiler_params=pltpu.CompilerParams(
            dimension_semantics=("parallel",),
        ),
        cost_estimate=pl.CostEstimate(
            flops=104 * b_pad,           # 2*(2*8 + 8*4 + 4*1) MACs per row
            transcendentals=2 * b_pad,   # exp + approx reciprocal per row
            bytes_accessed=12 * b_pad,   # 8 B in + 4 B out per row (kernel only)
        ),
    )(x3, w1, b1, w2, b2, w3, b3)

    return out.reshape(-1)[:B][:, None]  # (B, 1)


def init_params(key):
    """Deterministic synthetic params matching nn.Linear shapes, stored (in, out)."""
    k1, k2, k3, k4, k5, k6 = jax.random.split(key, 6)
    return {
        "w1": jax.random.normal(k1, (2, 8), jnp.float32) * 0.5,
        "b1": jax.random.normal(k2, (1, 8), jnp.float32) * 0.1,
        "w2": jax.random.normal(k3, (8, 4), jnp.float32) * 0.5,
        "b2": jax.random.normal(k4, (1, 4), jnp.float32) * 0.1,
        "w3": jax.random.normal(k5, (4, 1), jnp.float32) * 0.5,
        "b3": jax.random.normal(k6, (1, 1), jnp.float32) * 0.1,
    }


def reference_forward(x, params):
    hp = jax.lax.Precision.HIGHEST
    h1 = jnp.maximum(jnp.dot(x, params["w1"], precision=hp) + params["b1"], 0.0)
    h2 = jnp.maximum(jnp.dot(h1, params["w2"], precision=hp) + params["b2"], 0.0)
    return jax.nn.sigmoid(jnp.dot(h2, params["w3"], precision=hp) + params["b3"])


if __name__ == "__main__":
    key = jax.random.PRNGKey(0)
    kx, kx2, kp = jax.random.split(key, 3)
    params = init_params(kp)

    # Small batch: single block, heavy padding path.
    B = 8
    x = jax.random.normal(kx, (B, 2), jnp.float32)
    out = jax.block_until_ready(compare_nn_forward(x, params))
    ref = reference_forward(x, params)
    assert out.shape == (B, 1)
    assert jnp.allclose(out, ref, atol=2e-3, rtol=2e-3), "mismatch vs reference"

    # Unaligned batch with grid > 1 (exercises padding + multi-step grid).
    B2 = 4097
    x2 = jax.random.normal(kx2, (B2, 2), jnp.float32)
    out2 = jax.block_until_ready(compare_nn_forward(x2, params, rows_per_block=8))
    ref2 = reference_forward(x2, params)
    assert out2.shape == (B2, 1)
    assert jnp.allclose(out2, ref2, atol=2e-3, rtol=2e-3), "mismatch vs reference (B2)"

    print("KERNEL_OK")
</pallas_src>

<mosaic_0001>
module attributes {stable_mosaic.version = 11 : i64} {
  func.func @_mlp_kernel(%arg0: i32, %arg1: memref<2x8x256xf32, #tpu.memory_space<vmem>>, %arg2: memref<2x8xf32, #tpu.memory_space<smem>>, %arg3: memref<1x8xf32, #tpu.memory_space<smem>>, %arg4: memref<8x4xf32, #tpu.memory_space<smem>>, %arg5: memref<1x4xf32, #tpu.memory_space<smem>>, %arg6: memref<4x1xf32, #tpu.memory_space<smem>>, %arg7: memref<1x1xf32, #tpu.memory_space<smem>>, %arg8: memref<8x256xf32, #tpu.memory_space<vmem>>) attributes {dimension_semantics = [#tpu.dimension_semantics<parallel>], iteration_bounds = array<i64: 1>, scalar_prefetch = 0 : i64, scratch_operands = 0 : i64, tpu.core_type = #tpu.core_type<tc>, window_params = [{transform_indices = @transform_0, window_bounds = array<i64: 2, 8, 256>}, {transform_indices = @transform_1, window_bounds = array<i64: 2, 8>}, {transform_indices = @transform_2, window_bounds = array<i64: 1, 8>}, {transform_indices = @transform_3, window_bounds = array<i64: 8, 4>}, {transform_indices = @transform_4, window_bounds = array<i64: 1, 4>}, {transform_indices = @transform_5, window_bounds = array<i64: 4, 1>}, {transform_indices = @transform_6, window_bounds = array<i64: 1, 1>}, {transform_indices = @transform_7, window_bounds = array<i64: 8, 256>}]} {
    %c0 = arith.constant 0 : index
    %c0_0 = arith.constant 0 : index
    %0 = memref.load %arg2[%c0, %c0_0] : memref<2x8xf32, #tpu.memory_space<smem>>
    %c0_1 = arith.constant 0 : index
    %c1 = arith.constant 1 : index
    %1 = memref.load %arg2[%c0_1, %c1] : memref<2x8xf32, #tpu.memory_space<smem>>
    %c0_2 = arith.constant 0 : index
    %c2 = arith.constant 2 : index
    %2 = memref.load %arg2[%c0_2, %c2] : memref<2x8xf32, #tpu.memory_space<smem>>
    %c0_3 = arith.constant 0 : index
    %c3 = arith.constant 3 : index
    %3 = memref.load %arg2[%c0_3, %c3] : memref<2x8xf32, #tpu.memory_space<smem>>
    %c0_4 = arith.constant 0 : index
    %c4 = arith.constant 4 : index
    %4 = memref.load %arg2[%c0_4, %c4] : memref<2x8xf32, #tpu.memory_space<smem>>
    %c0_5 = arith.constant 0 : index
    %c5 = arith.constant 5 : index
    %5 = memref.load %arg2[%c0_5, %c5] : memref<2x8xf32, #tpu.memory_space<smem>>
    %c0_6 = arith.constant 0 : index
    %c6 = arith.constant 6 : index
    %6 = memref.load %arg2[%c0_6, %c6] : memref<2x8xf32, #tpu.memory_space<smem>>
    %c0_7 = arith.constant 0 : index
    %c7 = arith.constant 7 : index
    %7 = memref.load %arg2[%c0_7, %c7] : memref<2x8xf32, #tpu.memory_space<smem>>
    %c1_8 = arith.constant 1 : index
    %c0_9 = arith.constant 0 : index
    %8 = memref.load %arg2[%c1_8, %c0_9] : memref<2x8xf32, #tpu.memory_space<smem>>
    %c1_10 = arith.constant 1 : index
    %c1_11 = arith.constant 1 : index
    %9 = memref.load %arg2[%c1_10, %c1_11] : memref<2x8xf32, #tpu.memory_space<smem>>
    %c1_12 = arith.constant 1 : index
    %c2_13 = arith.constant 2 : index
    %10 = memref.load %arg2[%c1_12, %c2_13] : memref<2x8xf32, #tpu.memory_space<smem>>
    %c1_14 = arith.constant 1 : index
    %c3_15 = arith.constant 3 : index
    %11 = memref.load %arg2[%c1_14, %c3_15] : memref<2x8xf32, #tpu.memory_space<smem>>
    %c1_16 = arith.constant 1 : index
    %c4_17 = arith.constant 4 : index
    %12 = memref.load %arg2[%c1_16, %c4_17] : memref<2x8xf32, #tpu.memory_space<smem>>
    %c1_18 = arith.constant 1 : index
    %c5_19 = arith.constant 5 : index
    %13 = memref.load %arg2[%c1_18, %c5_19] : memref<2x8xf32, #tpu.memory_space<smem>>
    %c1_20 = arith.constant 1 : index
    %c6_21 = arith.constant 6 : index
    %14 = memref.load %arg2[%c1_20, %c6_21] : memref<2x8xf32, #tpu.memory_space<smem>>
    %c1_22 = arith.constant 1 : index
    %c7_23 = arith.constant 7 : index
    %15 = memref.load %arg2[%c1_22, %c7_23] : memref<2x8xf32, #tpu.memory_space<smem>>
    %c0_24 = arith.constant 0 : index
    %c0_25 = arith.constant 0 : index
    %16 = memref.load %arg3[%c0_24, %c0_25] : memref<1x8xf32, #tpu.memory_space<smem>>
    %c0_26 = arith.constant 0 : index
    %c1_27 = arith.constant 1 : index
    %17 = memref.load %arg3[%c0_26, %c1_27] : memref<1x8xf32, #tpu.memory_space<smem>>
    %c0_28 = arith.constant 0 : index
    %c2_29 = arith.constant 2 : index
    %18 = memref.load %arg3[%c0_28, %c2_29] : memref<1x8xf32, #tpu.memory_space<smem>>
    %c0_30 = arith.constant 0 : index
    %c3_31 = arith.constant 3 : index
    %19 = memref.load %arg3[%c0_30, %c3_31] : memref<1x8xf32, #tpu.memory_space<smem>>
    %c0_32 = arith.constant 0 : index
    %c4_33 = arith.constant 4 : index
    %20 = memref.load %arg3[%c0_32, %c4_33] : memref<1x8xf32, #tpu.memory_space<smem>>
    %c0_34 = arith.constant 0 : index
    %c5_35 = arith.constant 5 : index
    %21 = memref.load %arg3[%c0_34, %c5_35] : memref<1x8xf32, #tpu.memory_space<smem>>
    %c0_36 = arith.constant 0 : index
    %c6_37 = arith.constant 6 : index
    %22 = memref.load %arg3[%c0_36, %c6_37] : memref<1x8xf32, #tpu.memory_space<smem>>
    %c0_38 = arith.constant 0 : index
    %c7_39 = arith.constant 7 : index
    %23 = memref.load %arg3[%c0_38, %c7_39] : memref<1x8xf32, #tpu.memory_space<smem>>
    %c0_40 = arith.constant 0 : index
    %c0_41 = arith.constant 0 : index
    %24 = memref.load %arg4[%c0_40, %c0_41] : memref<8x4xf32, #tpu.memory_space<smem>>
    %c0_42 = arith.constant 0 : index
    %c1_43 = arith.constant 1 : index
    %25 = memref.load %arg4[%c0_42, %c1_43] : memref<8x4xf32, #tpu.memory_space<smem>>
    %c0_44 = arith.constant 0 : index
    %c2_45 = arith.constant 2 : index
    %26 = memref.load %arg4[%c0_44, %c2_45] : memref<8x4xf32, #tpu.memory_space<smem>>
    %c0_46 = arith.constant 0 : index
    %c3_47 = arith.constant 3 : index
    %27 = memref.load %arg4[%c0_46, %c3_47] : memref<8x4xf32, #tpu.memory_space<smem>>
    %c1_48 = arith.constant 1 : index
    %c0_49 = arith.constant 0 : index
    %28 = memref.load %arg4[%c1_48, %c0_49] : memref<8x4xf32, #tpu.memory_space<smem>>
    %c1_50 = arith.constant 1 : index
    %c1_51 = arith.constant 1 : index
    %29 = memref.load %arg4[%c1_50, %c1_51] : memref<8x4xf32, #tpu.memory_space<smem>>
    %c1_52 = arith.constant 1 : index
    %c2_53 = arith.constant 2 : index
    %30 = memref.load %arg4[%c1_52, %c2_53] : memref<8x4xf32, #tpu.memory_space<smem>>
    %c1_54 = arith.constant 1 : index
    %c3_55 = arith.constant 3 : index
    %31 = memref.load %arg4[%c1_54, %c3_55] : memref<8x4xf32, #tpu.memory_space<smem>>
    %c2_56 = arith.constant 2 : index
    %c0_57 = arith.constant 0 : index
    %32 = memref.load %arg4[%c2_56, %c0_57] : memref<8x4xf32, #tpu.memory_space<smem>>
    %c2_58 = arith.constant 2 : index
    %c1_59 = arith.constant 1 : index
    %33 = memref.load %arg4[%c2_58, %c1_59] : memref<8x4xf32, #tpu.memory_space<smem>>
    %c2_60 = arith.constant 2 : index
    %c2_61 = arith.constant 2 : index
    %34 = memref.load %arg4[%c2_60, %c2_61] : memref<8x4xf32, #tpu.memory_space<smem>>
    %c2_62 = arith.constant 2 : index
    %c3_63 = arith.constant 3 : index
    %35 = memref.load %arg4[%c2_62, %c3_63] : memref<8x4xf32, #tpu.memory_space<smem>>
    %c3_64 = arith.constant 3 : index
    %c0_65 = arith.constant 0 : index
    %36 = memref.load %arg4[%c3_64, %c0_65] : memref<8x4xf32, #tpu.memory_space<smem>>
    %c3_66 = arith.constant 3 : index
    %c1_67 = arith.constant 1 : index
    %37 = memref.load %arg4[%c3_66, %c1_67] : memref<8x4xf32, #tpu.memory_space<smem>>
    %c3_68 = arith.constant 3 : index
    %c2_69 = arith.constant 2 : index
    %38 = memref.load %arg4[%c3_68, %c2_69] : memref<8x4xf32, #tpu.memory_space<smem>>
    %c3_70 = arith.constant 3 : index
    %c3_71 = arith.constant 3 : index
    %39 = memref.load %arg4[%c3_70, %c3_71] : memref<8x4xf32, #tpu.memory_space<smem>>
    %c4_72 = arith.constant 4 : index
    %c0_73 = arith.constant 0 : index
    %40 = memref.load %arg4[%c4_72, %c0_73] : memref<8x4xf32, #tpu.memory_space<smem>>
    %c4_74 = arith.constant 4 : index
    %c1_75 = arith.constant 1 : index
    %41 = memref.load %arg4[%c4_74, %c1_75] : memref<8x4xf32, #tpu.memory_space<smem>>
    %c4_76 = arith.constant 4 : index
    %c2_77 = arith.constant 2 : index
    %42 = memref.load %arg4[%c4_76, %c2_77] : memref<8x4xf32, #tpu.memory_space<smem>>
    %c4_78 = arith.constant 4 : index
    %c3_79 = arith.constant 3 : index
    %43 = memref.load %arg4[%c4_78, %c3_79] : memref<8x4xf32, #tpu.memory_space<smem>>
    %c5_80 = arith.constant 5 : index
    %c0_81 = arith.constant 0 : index
    %44 = memref.load %arg4[%c5_80, %c0_81] : memref<8x4xf32, #tpu.memory_space<smem>>
    %c5_82 = arith.constant 5 : index
    %c1_83 = arith.constant 1 : index
    %45 = memref.load %arg4[%c5_82, %c1_83] : memref<8x4xf32, #tpu.memory_space<smem>>
    %c5_84 = arith.constant 5 : index
    %c2_85 = arith.constant 2 : index
    %46 = memref.load %arg4[%c5_84, %c2_85] : memref<8x4xf32, #tpu.memory_space<smem>>
    %c5_86 = arith.constant 5 : index
    %c3_87 = arith.constant 3 : index
    %47 = memref.load %arg4[%c5_86, %c3_87] : memref<8x4xf32, #tpu.memory_space<smem>>
    %c6_88 = arith.constant 6 : index
    %c0_89 = arith.constant 0 : index
    %48 = memref.load %arg4[%c6_88, %c0_89] : memref<8x4xf32, #tpu.memory_space<smem>>
    %c6_90 = arith.constant 6 : index
    %c1_91 = arith.constant 1 : index
    %49 = memref.load %arg4[%c6_90, %c1_91] : memref<8x4xf32, #tpu.memory_space<smem>>
    %c6_92 = arith.constant 6 : index
    %c2_93 = arith.constant 2 : index
    %50 = memref.load %arg4[%c6_92, %c2_93] : memref<8x4xf32, #tpu.memory_space<smem>>
    %c6_94 = arith.constant 6 : index
    %c3_95 = arith.constant 3 : index
    %51 = memref.load %arg4[%c6_94, %c3_95] : memref<8x4xf32, #tpu.memory_space<smem>>
    %c7_96 = arith.constant 7 : index
    %c0_97 = arith.constant 0 : index
    %52 = memref.load %arg4[%c7_96, %c0_97] : memref<8x4xf32, #tpu.memory_space<smem>>
    %c7_98 = arith.constant 7 : index
    %c1_99 = arith.constant 1 : index
    %53 = memref.load %arg4[%c7_98, %c1_99] : memref<8x4xf32, #tpu.memory_space<smem>>
    %c7_100 = arith.constant 7 : index
    %c2_101 = arith.constant 2 : index
    %54 = memref.load %arg4[%c7_100, %c2_101] : memref<8x4xf32, #tpu.memory_space<smem>>
    %c7_102 = arith.constant 7 : index
    %c3_103 = arith.constant 3 : index
    %55 = memref.load %arg4[%c7_102, %c3_103] : memref<8x4xf32, #tpu.memory_space<smem>>
    %c0_104 = arith.constant 0 : index
    %c0_105 = arith.constant 0 : index
    %56 = memref.load %arg5[%c0_104, %c0_105] : memref<1x4xf32, #tpu.memory_space<smem>>
    %c0_106 = arith.constant 0 : index
    %c1_107 = arith.constant 1 : index
    %57 = memref.load %arg5[%c0_106, %c1_107] : memref<1x4xf32, #tpu.memory_space<smem>>
    %c0_108 = arith.constant 0 : index
    %c2_109 = arith.constant 2 : index
    %58 = memref.load %arg5[%c0_108, %c2_109] : memref<1x4xf32, #tpu.memory_space<smem>>
    %c0_110 = arith.constant 0 : index
    %c3_111 = arith.constant 3 : index
    %59 = memref.load %arg5[%c0_110, %c3_111] : memref<1x4xf32, #tpu.memory_space<smem>>
    %c0_112 = arith.constant 0 : index
    %c0_113 = arith.constant 0 : index
    %60 = memref.load %arg6[%c0_112, %c0_113] : memref<4x1xf32, #tpu.memory_space<smem>>
    %c1_114 = arith.constant 1 : index
    %c0_115 = arith.constant 0 : index
    %61 = memref.load %arg6[%c1_114, %c0_115] : memref<4x1xf32, #tpu.memory_space<smem>>
    %c2_116 = arith.constant 2 : index
    %c0_117 = arith.constant 0 : index
    %62 = memref.load %arg6[%c2_116, %c0_117] : memref<4x1xf32, #tpu.memory_space<smem>>
    %c3_118 = arith.constant 3 : index
    %c0_119 = arith.constant 0 : index
    %63 = memref.load %arg6[%c3_118, %c0_119] : memref<4x1xf32, #tpu.memory_space<smem>>
    %c0_120 = arith.constant 0 : index
    %c0_121 = arith.constant 0 : index
    %64 = memref.load %arg7[%c0_120, %c0_121] : memref<1x1xf32, #tpu.memory_space<smem>>
    %c0_i32 = arith.constant 0 : i32
    %c8_i32 = arith.constant 8 : i32
    %65 = arith.muli %c0_i32, %c8_i32 : i32
    %66 = tpu.assume_multiple %65, 8 : i32
    %c0_122 = arith.constant 0 : index
    %67 = arith.index_cast %66 : i32 to index
    %c0_123 = arith.constant 0 : index
    %68 = vector.load %arg1[%c0_122, %67, %c0_123] : memref<2x8x256xf32, #tpu.memory_space<vmem>>, vector<1x8x256xf32>
    %69 = vector.shape_cast %68 : vector<1x8x256xf32> to vector<8x256xf32>
    %c1_124 = arith.constant 1 : index
    %70 = arith.index_cast %66 : i32 to index
    %c0_125 = arith.constant 0 : index
    %71 = vector.load %arg1[%c1_124, %70, %c0_125] : memref<2x8x256xf32, #tpu.memory_space<vmem>>, vector<1x8x256xf32>
    %72 = vector.shape_cast %71 : vector<1x8x256xf32> to vector<8x256xf32>
    %73 = vector.broadcast %0 : f32 to vector<8x256xf32>
    %74 = arith.mulf %73, %69 : vector<8x256xf32>
    %75 = vector.broadcast %8 : f32 to vector<8x256xf32>
    %76 = arith.mulf %75, %72 : vector<8x256xf32>
    %77 = arith.addf %74, %76 : vector<8x256xf32>
    %78 = vector.broadcast %16 : f32 to vector<8x256xf32>
    %79 = arith.addf %77, %78 : vector<8x256xf32>
    %cst = arith.constant 0.000000e+00 : f32
    %80 = vector.broadcast %cst : f32 to vector<8x256xf32>
    %81 = arith.maximumf %79, %80 : vector<8x256xf32>
    %82 = vector.broadcast %1 : f32 to vector<8x256xf32>
    %83 = arith.mulf %82, %69 : vector<8x256xf32>
    %84 = vector.broadcast %9 : f32 to vector<8x256xf32>
    %85 = arith.mulf %84, %72 : vector<8x256xf32>
    %86 = arith.addf %83, %85 : vector<8x256xf32>
    %87 = vector.broadcast %17 : f32 to vector<8x256xf32>
    %88 = arith.addf %86, %87 : vector<8x256xf32>
    %cst_126 = arith.constant 0.000000e+00 : f32
    %89 = vector.broadcast %cst_126 : f32 to vector<8x256xf32>
    %90 = arith.maximumf %88, %89 : vector<8x256xf32>
    %91 = vector.broadcast %2 : f32 to vector<8x256xf32>
    %92 = arith.mulf %91, %69 : vector<8x256xf32>
    %93 = vector.broadcast %10 : f32 to vector<8x256xf32>
    %94 = arith.mulf %93, %72 : vector<8x256xf32>
    %95 = arith.addf %92, %94 : vector<8x256xf32>
    %96 = vector.broadcast %18 : f32 to vector<8x256xf32>
    %97 = arith.addf %95, %96 : vector<8x256xf32>
    %cst_127 = arith.constant 0.000000e+00 : f32
    %98 = vector.broadcast %cst_127 : f32 to vector<8x256xf32>
    %99 = arith.maximumf %97, %98 : vector<8x256xf32>
    %100 = vector.broadcast %3 : f32 to vector<8x256xf32>
    %101 = arith.mulf %100, %69 : vector<8x256xf32>
    %102 = vector.broadcast %11 : f32 to vector<8x256xf32>
    %103 = arith.mulf %102, %72 : vector<8x256xf32>
    %104 = arith.addf %101, %103 : vector<8x256xf32>
    %105 = vector.broadcast %19 : f32 to vector<8x256xf32>
    %106 = arith.addf %104, %105 : vector<8x256xf32>
    %cst_128 = arith.constant 0.000000e+00 : f32
    %107 = vector.broadcast %cst_128 : f32 to vector<8x256xf32>
    %108 = arith.maximumf %106, %107 : vector<8x256xf32>
    %109 = vector.broadcast %4 : f32 to vector<8x256xf32>
    %110 = arith.mulf %109, %69 : vector<8x256xf32>
    %111 = vector.broadcast %12 : f32 to vector<8x256xf32>
    %112 = arith.mulf %111, %72 : vector<8x256xf32>
    %113 = arith.addf %110, %112 : vector<8x256xf32>
    %114 = vector.broadcast %20 : f32 to vector<8x256xf32>
    %115 = arith.addf %113, %114 : vector<8x256xf32>
    %cst_129 = arith.constant 0.000000e+00 : f32
    %116 = vector.broadcast %cst_129 : f32 to vector<8x256xf32>
    %117 = arith.maximumf %115, %116 : vector<8x256xf32>
    %118 = vector.broadcast %5 : f32 to vector<8x256xf32>
    %119 = arith.mulf %118, %69 : vector<8x256xf32>
    %120 = vector.broadcast %13 : f32 to vector<8x256xf32>
    %121 = arith.mulf %120, %72 : vector<8x256xf32>
    %122 = arith.addf %119, %121 : vector<8x256xf32>
    %123 = vector.broadcast %21 : f32 to vector<8x256xf32>
    %124 = arith.addf %122, %123 : vector<8x256xf32>
    %cst_130 = arith.constant 0.000000e+00 : f32
    %125 = vector.broadcast %cst_130 : f32 to vector<8x256xf32>
    %126 = arith.maximumf %124, %125 : vector<8x256xf32>
    %127 = vector.broadcast %6 : f32 to vector<8x256xf32>
    %128 = arith.mulf %127, %69 : vector<8x256xf32>
    %129 = vector.broadcast %14 : f32 to vector<8x256xf32>
    %130 = arith.mulf %129, %72 : vector<8x256xf32>
    %131 = arith.addf %128, %130 : vector<8x256xf32>
    %132 = vector.broadcast %22 : f32 to vector<8x256xf32>
    %133 = arith.addf %131, %132 : vector<8x256xf32>
    %cst_131 = arith.constant 0.000000e+00 : f32
    %134 = vector.broadcast %cst_131 : f32 to vector<8x256xf32>
    %135 = arith.maximumf %133, %134 : vector<8x256xf32>
    %136 = vector.broadcast %7 : f32 to vector<8x256xf32>
    %137 = arith.mulf %136, %69 : vector<8x256xf32>
    %138 = vector.broadcast %15 : f32 to vector<8x256xf32>
    %139 = arith.mulf %138, %72 : vector<8x256xf32>
    %140 = arith.addf %137, %139 : vector<8x256xf32>
    %141 = vector.broadcast %23 : f32 to vector<8x256xf32>
    %142 = arith.addf %140, %141 : vector<8x256xf32>
    %cst_132 = arith.constant 0.000000e+00 : f32
    %143 = vector.broadcast %cst_132 : f32 to vector<8x256xf32>
    %144 = arith.maximumf %142, %143 : vector<8x256xf32>
    %145 = vector.broadcast %24 : f32 to vector<8x256xf32>
    %146 = arith.mulf %145, %81 : vector<8x256xf32>
    %147 = vector.broadcast %28 : f32 to vector<8x256xf32>
    %148 = arith.mulf %147, %90 : vector<8x256xf32>
    %149 = arith.addf %146, %148 : vector<8x256xf32>
    %150 = vector.broadcast %32 : f32 to vector<8x256xf32>
    %151 = arith.mulf %150, %99 : vector<8x256xf32>
    %152 = arith.addf %149, %151 : vector<8x256xf32>
    %153 = vector.broadcast %36 : f32 to vector<8x256xf32>
    %154 = arith.mulf %153, %108 : vector<8x256xf32>
    %155 = arith.addf %152, %154 : vector<8x256xf32>
    %156 = vector.broadcast %40 : f32 to vector<8x256xf32>
    %157 = arith.mulf %156, %117 : vector<8x256xf32>
    %158 = arith.addf %155, %157 : vector<8x256xf32>
    %159 = vector.broadcast %44 : f32 to vector<8x256xf32>
    %160 = arith.mulf %159, %126 : vector<8x256xf32>
    %161 = arith.addf %158, %160 : vector<8x256xf32>
    %162 = vector.broadcast %48 : f32 to vector<8x256xf32>
    %163 = arith.mulf %162, %135 : vector<8x256xf32>
    %164 = arith.addf %161, %163 : vector<8x256xf32>
    %165 = vector.broadcast %52 : f32 to vector<8x256xf32>
    %166 = arith.mulf %165, %144 : vector<8x256xf32>
    %167 = arith.addf %164, %166 : vector<8x256xf32>
    %168 = vector.broadcast %56 : f32 to vector<8x256xf32>
    %169 = arith.addf %167, %168 : vector<8x256xf32>
    %cst_133 = arith.constant 0.000000e+00 : f32
    %170 = vector.broadcast %cst_133 : f32 to vector<8x256xf32>
    %171 = arith.maximumf %169, %170 : vector<8x256xf32>
    %172 = vector.broadcast %25 : f32 to vector<8x256xf32>
    %173 = arith.mulf %172, %81 : vector<8x256xf32>
    %174 = vector.broadcast %29 : f32 to vector<8x256xf32>
    %175 = arith.mulf %174, %90 : vector<8x256xf32>
    %176 = arith.addf %173, %175 : vector<8x256xf32>
    %177 = vector.broadcast %33 : f32 to vector<8x256xf32>
    %178 = arith.mulf %177, %99 : vector<8x256xf32>
    %179 = arith.addf %176, %178 : vector<8x256xf32>
    %180 = vector.broadcast %37 : f32 to vector<8x256xf32>
    %181 = arith.mulf %180, %108 : vector<8x256xf32>
    %182 = arith.addf %179, %181 : vector<8x256xf32>
    %183 = vector.broadcast %41 : f32 to vector<8x256xf32>
    %184 = arith.mulf %183, %117 : vector<8x256xf32>
    %185 = arith.addf %182, %184 : vector<8x256xf32>
    %186 = vector.broadcast %45 : f32 to vector<8x256xf32>
    %187 = arith.mulf %186, %126 : vector<8x256xf32>
    %188 = arith.addf %185, %187 : vector<8x256xf32>
    %189 = vector.broadcast %49 : f32 to vector<8x256xf32>
    %190 = arith.mulf %189, %135 : vector<8x256xf32>
    %191 = arith.addf %188, %190 : vector<8x256xf32>
    %192 = vector.broadcast %53 : f32 to vector<8x256xf32>
    %193 = arith.mulf %192, %144 : vector<8x256xf32>
    %194 = arith.addf %191, %193 : vector<8x256xf32>
    %195 = vector.broadcast %57 : f32 to vector<8x256xf32>
    %196 = arith.addf %194, %195 : vector<8x256xf32>
    %cst_134 = arith.constant 0.000000e+00 : f32
    %197 = vector.broadcast %cst_134 : f32 to vector<8x256xf32>
    %198 = arith.maximumf %196, %197 : vector<8x256xf32>
    %199 = vector.broadcast %26 : f32 to vector<8x256xf32>
    %200 = arith.mulf %199, %81 : vector<8x256xf32>
    %201 = vector.broadcast %30 : f32 to vector<8x256xf32>
    %202 = arith.mulf %201, %90 : vector<8x256xf32>
    %203 = arith.addf %200, %202 : vector<8x256xf32>
    %204 = vector.broadcast %34 : f32 to vector<8x256xf32>
    %205 = arith.mulf %204, %99 : vector<8x256xf32>
    %206 = arith.addf %203, %205 : vector<8x256xf32>
    %207 = vector.broadcast %38 : f32 to vector<8x256xf32>
    %208 = arith.mulf %207, %108 : vector<8x256xf32>
    %209 = arith.addf %206, %208 : vector<8x256xf32>
    %210 = vector.broadcast %42 : f32 to vector<8x256xf32>
    %211 = arith.mulf %210, %117 : vector<8x256xf32>
    %212 = arith.addf %209, %211 : vector<8x256xf32>
    %213 = vector.broadcast %46 : f32 to vector<8x256xf32>
    %214 = arith.mulf %213, %126 : vector<8x256xf32>
    %215 = arith.addf %212, %214 : vector<8x256xf32>
    %216 = vector.broadcast %50 : f32 to vector<8x256xf32>
    %217 = arith.mulf %216, %135 : vector<8x256xf32>
    %218 = arith.addf %215, %217 : vector<8x256xf32>
    %219 = vector.broadcast %54 : f32 to vector<8x256xf32>
    %220 = arith.mulf %219, %144 : vector<8x256xf32>
    %221 = arith.addf %218, %220 : vector<8x256xf32>
    %222 = vector.broadcast %58 : f32 to vector<8x256xf32>
    %223 = arith.addf %221, %222 : vector<8x256xf32>
    %cst_135 = arith.constant 0.000000e+00 : f32
    %224 = vector.broadcast %cst_135 : f32 to vector<8x256xf32>
    %225 = arith.maximumf %223, %224 : vector<8x256xf32>
    %226 = vector.broadcast %27 : f32 to vector<8x256xf32>
    %227 = arith.mulf %226, %81 : vector<8x256xf32>
    %228 = vector.broadcast %31 : f32 to vector<8x256xf32>
    %229 = arith.mulf %228, %90 : vector<8x256xf32>
    %230 = arith.addf %227, %229 : vector<8x256xf32>
    %231 = vector.broadcast %35 : f32 to vector<8x256xf32>
    %232 = arith.mulf %231, %99 : vector<8x256xf32>
    %233 = arith.addf %230, %232 : vector<8x256xf32>
    %234 = vector.broadcast %39 : f32 to vector<8x256xf32>
    %235 = arith.mulf %234, %108 : vector<8x256xf32>
    %236 = arith.addf %233, %235 : vector<8x256xf32>
    %237 = vector.broadcast %43 : f32 to vector<8x256xf32>
    %238 = arith.mulf %237, %117 : vector<8x256xf32>
    %239 = arith.addf %236, %238 : vector<8x256xf32>
    %240 = vector.broadcast %47 : f32 to vector<8x256xf32>
    %241 = arith.mulf %240, %126 : vector<8x256xf32>
    %242 = arith.addf %239, %241 : vector<8x256xf32>
    %243 = vector.broadcast %51 : f32 to vector<8x256xf32>
    %244 = arith.mulf %243, %135 : vector<8x256xf32>
    %245 = arith.addf %242, %244 : vector<8x256xf32>
    %246 = vector.broadcast %55 : f32 to vector<8x256xf32>
    %247 = arith.mulf %246, %144 : vector<8x256xf32>
    %248 = arith.addf %245, %247 : vector<8x256xf32>
    %249 = vector.broadcast %59 : f32 to vector<8x256xf32>
    %250 = arith.addf %248, %249 : vector<8x256xf32>
    %cst_136 = arith.constant 0.000000e+00 : f32
    %251 = vector.broadcast %cst_136 : f32 to vector<8x256xf32>
    %252 = arith.maximumf %250, %251 : vector<8x256xf32>
    %253 = vector.broadcast %60 : f32 to vector<8x256xf32>
    %254 = arith.mulf %253, %171 : vector<8x256xf32>
    %255 = vector.broadcast %61 : f32 to vector<8x256xf32>
    %256 = arith.mulf %255, %198 : vector<8x256xf32>
    %257 = arith.addf %254, %256 : vector<8x256xf32>
    %258 = vector.broadcast %62 : f32 to vector<8x256xf32>
    %259 = arith.mulf %258, %225 : vector<8x256xf32>
    %260 = arith.addf %257, %259 : vector<8x256xf32>
    %261 = vector.broadcast %63 : f32 to vector<8x256xf32>
    %262 = arith.mulf %261, %252 : vector<8x256xf32>
    %263 = arith.addf %260, %262 : vector<8x256xf32>
    %264 = vector.broadcast %64 : f32 to vector<8x256xf32>
    %265 = arith.addf %263, %264 : vector<8x256xf32>
    %cst_137 = arith.constant 0.000000e+00 : f32
    %266 = vector.broadcast %cst_137 : f32 to vector<8x256xf32>
    %267 = arith.subf %266, %265 : vector<8x256xf32>
    %268 = math.exp %267 : vector<8x256xf32>
    %cst_138 = arith.constant 1.000000e+00 : f32
    %269 = vector.broadcast %cst_138 : f32 to vector<8x256xf32>
    %270 = arith.addf %269, %268 : vector<8x256xf32>
    %271 = tpu.reciprocal %270 {approx = true} : vector<8x256xf32> -> vector<8x256xf32>
    %272 = arith.index_cast %66 : i32 to index
    %c0_139 = arith.constant 0 : index
    %273 = vector.load %arg8[%272, %c0_139] : memref<8x256xf32, #tpu.memory_space<vmem>>, vector<8x256xf32>
    tpu.vector_store %arg8[%272, %c0_139], %271 {strides = array<i32>} : memref<8x256xf32, #tpu.memory_space<vmem>>, vector<8x256xf32>,
    %c1_i32 = arith.constant 1 : i32
    return
  }
  func.func @transform_0(%arg0: i32) -> (i32, i32, i32) {
    %c0_i32 = arith.constant 0 : i32
    %c0_i32_0 = arith.constant 0 : i32
    %c0_i32_1 = arith.constant 0 : i32
    return %c0_i32, %arg0, %c0_i32_0 : i32, i32, i32
  }
  func.func @transform_1(%arg0: i32) -> (i32, i32) {
    %c0_i32 = arith.constant 0 : i32
    %c0_i32_0 = arith.constant 0 : i32
    %c0_i32_1 = arith.constant 0 : i32
    return %c0_i32, %c0_i32_0 : i32, i32
  }
  func.func @transform_2(%arg0: i32) -> (i32, i32) {
    %c0_i32 = arith.constant 0 : i32
    %c0_i32_0 = arith.constant 0 : i32
    %c0_i32_1 = arith.constant 0 : i32
    return %c0_i32, %c0_i32_0 : i32, i32
  }
  func.func @transform_3(%arg0: i32) -> (i32, i32) {
    %c0_i32 = arith.constant 0 : i32
    %c0_i32_0 = arith.constant 0 : i32
    %c0_i32_1 = arith.constant 0 : i32
    return %c0_i32, %c0_i32_0 : i32, i32
  }
  func.func @transform_4(%arg0: i32) -> (i32, i32) {
    %c0_i32 = arith.constant 0 : i32
    %c0_i32_0 = arith.constant 0 : i32
    %c0_i32_1 = arith.constant 0 : i32
    return %c0_i32, %c0_i32_0 : i32, i32
  }
  func.func @transform_5(%arg0: i32) -> (i32, i32) {
    %c0_i32 = arith.constant 0 : i32
    %c0_i32_0 = arith.constant 0 : i32
    %c0_i32_1 = arith.constant 0 : i32
    return %c0_i32, %c0_i32_0 : i32, i32
  }
  func.func @transform_6(%arg0: i32) -> (i32, i32) {
    %c0_i32 = arith.constant 0 : i32
    %c0_i32_0 = arith.constant 0 : i32
    %c0_i32_1 = arith.constant 0 : i32
    return %c0_i32, %c0_i32_0 : i32, i32
  }
  func.func @transform_7(%arg0: i32) -> (i32, i32) {
    %c0_i32 = arith.constant 0 : i32
    %c0_i32_0 = arith.constant 0 : i32
    return %arg0, %c0_i32 : i32, i32
  }
}

</mosaic_0001>

<bundles_post_ra>
// kernel: tpu_custom_call.1
= control target key start
LH: loop header
LB: loop body
LE: loop exit
PB: predicated region body
PF: predicated region fallthrough
CT: control target
= control target key end

     0   :  { %13 = vsyncpa [#allocation4], 0  ;;  %s1119_s0 = inlined_call_operand.hbm [shape: f32[2,8,256], index: 0, kind: input, shape index: {}]   ;;  %s1120_s1 = inlined_call_operand.vmem [shape: f32[2,8], index: 1, kind: input, shape index: {}]   ;;  %s1121_s2 = inlined_call_operand.vmem [shape: f32[1,8], index: 2, kind: input, shape index: {}]   ;;  %s1122_s3 = inlined_call_operand.vmem [shape: f32[8,4], index: 3, kind: input, shape index: {}]   ;;  %s1123_s4 = inlined_call_operand.vmem [shape: f32[1,4], index: 4, kind: input, shape index: {}]   ;;  %s1124_s5 = inlined_call_operand.vmem [shape: f32[4,1], index: 5, kind: input, shape index: {}]   ;;  %s1125_s6 = inlined_call_operand.<no memory space> [shape: f32[1,1], index: 6, kind: input, shape index: {}]   ;;  %s1126_s7 = inlined_call_operand.hbm [shape: f32[8,256], index: 7, kind: output, shape index: {}]  }
   0x1   :  { %14 = vsyncpa [#allocation6], 0 }
   0x2   :  { %15 = vsyncpa [#allocation9], 0 }
   0x3   :  { %16 = vsyncpa [#allocation12], 0  ;;  %s46_s26 = sshll.u32 %s1121_s2, 4  ;;  %s47_s26 = int_to_ptr.vmem [resolvable:$true] %s46_s26 }
   0x4   :  { %17 = vsyncpa [#allocation5], 0  ;;  %s66_s29 = sshll.u32 %s1123_s4, 4  ;;  %s582_s30 = scalar_lea.vmem %s47_s26, 16  ;;  %s67_s29 = int_to_ptr.vmem [resolvable:$true] %s66_s29 }
   0x5   :  { %p583_p0 = scmp.ne.s32.totalorder %s47_s26, %s582_s30  ;;  %p587_p1 = scmp.lt.s32.totalorder %s47_s26, %s47_s26 }
   0x6   :  { %p588_p2 = scmp.lt.s32.totalorder %s582_s30, %s582_s30 }
   0x8   :  { %p589_p3 = por %p588_p2, %p587_p1 }
   0xa   :  { %p590_p4 = pnand %p589_p3, %p583_p0 }
   0xc   :  { %593 = shalt.err (!%p590_p4)
}
   0xd   :  { %s696_s8 = smov [#allocation8]   ;;  %s594_s9 = scalar_lea.vmem %s67_s29, 16 }
   0xe   :  { %49 = dma.vmem_to_smem %s47_s26, 16, %s696_s8, [#allocation9]  }
   0xf   :  { %p595_p5 = scmp.ne.s32.totalorder %s67_s29, %s594_s9  ;;  %p599_p6 = scmp.lt.s32.totalorder %s67_s29, %s67_s29 }
  0x10   :  { %p600_p7 = scmp.lt.s32.totalorder %s594_s9, %s594_s9 }
  0x12   :  { %p601_p8 = por %p600_p7, %p599_p6 }
  0x14   :  { %p602_p9 = pnand %p601_p8, %p595_p5 }
  0x16   :  { %605 = shalt.err (!%p602_p9)
}
  0x17   :  { %s697_s2 = smov [#allocation11]   ;;  %s698_s4 = smov [#allocation3]  }
  0x18   :  { %69 = dma.vmem_to_smem %s67_s29, 16, %s697_s2, [#allocation12]  }
  0x19   :  { %s23_s10 = sshll.u32 %s698_s4, 4  ;;  %s36_s13 = sshll.u32 %s1120_s1, 4  ;;  %s24_s10 = int_to_ptr.vmem [resolvable:$true] %s23_s10  ;;  %s37_s13 = int_to_ptr.vmem [resolvable:$true] %s36_s13 }
  0x1a   :  { %s606_s16 = scalar_lea.hbm %s1119_s0, 512 }
  0x1b   :  { %p607_p10 = scmp.ne.s32.totalorder %s1119_s0, %s606_s16  ;;  %p610_p11 = scmp.lt.u32.totalorder %s606_s16, %s1119_s0 }
  0x1d   :  { %p612_p12 = pnand %p610_p11, %p607_p10 }
  0x1f   :  { %615 = shalt.err (!%p612_p12)
}
  0x20   :  { %s616_s21 = scalar_lea.vmem %s24_s10, 512  ;;  %p621_p0 = scmp.lt.s32.totalorder %s24_s10, %s24_s10 }
  0x21   :  { %p617_p13 = scmp.ne.s32.totalorder %s24_s10, %s616_s21  ;;  %p622_p1 = scmp.lt.s32.totalorder %s616_s21, %s616_s21 }
  0x23   :  { %p623_p2 = por %p622_p1, %p621_p0 }
  0x25   :  { %p624_p3 = pnand %p623_p2, %p617_p13 }
  0x27   :  { %627 = shalt.err (!%p624_p3)
}
  0x28   :  { %s699_s1 = smov 256   ;;  %s700_s22 = smov 16  }
  0x29   :  { %29 = dma.hbm_to_vmem [thread:$0]  %s1119_s0, 512, %s24_s10, [#allocation4], %s699_s1, %s699_s1, %s700_s22  }
  0x2a   :  { %s628_s25 = scalar_lea.vmem %s37_s13, 32  ;;  %p633_p5 = scmp.lt.s32.totalorder %s37_s13, %s37_s13 }
  0x2b   :  { %p629_p4 = scmp.ne.s32.totalorder %s37_s13, %s628_s25  ;;  %p634_p6 = scmp.lt.s32.totalorder %s628_s25, %s628_s25 }
  0x2d   :  { %p635_p7 = por %p634_p6, %p633_p5 }
  0x2f   :  { %p636_p8 = pnand %p635_p7, %p629_p4 }
  0x31   :  { %639 = shalt.err (!%p636_p8)
}
  0x32   :  { %s701_s26 = smov [#allocation7]   ;;  %s56_s29 = sshll.u32 %s1122_s3, 4  ;;  %s57_s29 = int_to_ptr.vmem [resolvable:$true] %s56_s29 }
  0x33   :  { %39 = dma.vmem_to_smem %s37_s13, 32, %s701_s26, [#allocation6]  }
  0x34   :  { %s76_s9 = sshll.u32 %s1124_s5, 4  ;;  %s640_s0 = scalar_lea.vmem %s57_s29, 128  ;;  %s77_s9 = int_to_ptr.vmem [resolvable:$true] %s76_s9 }
  0x35   :  { %p641_p9 = scmp.ne.s32.totalorder %s57_s29, %s640_s0  ;;  %p645_p10 = scmp.lt.s32.totalorder %s57_s29, %s57_s29 }
  0x36   :  { %p646_p11 = scmp.lt.s32.totalorder %s640_s0, %s640_s0 }
  0x38   :  { %p647_p12 = por %p646_p11, %p645_p10 }
  0x3a   :  { %p648_p13 = pnand %p647_p12, %p641_p9 }
  0x3c   :  { %651 = shalt.err (!%p648_p13)
}
  0x3d   :  { %s702_s2 = smov [#allocation10]   ;;  %s652_s4 = scalar_lea.vmem %s77_s9, 64 }
  0x3e   :  { %59 = dma.vmem_to_smem %s57_s29, 128, %s702_s2, [#allocation9]  }
  0x3f   :  { %p653_p0 = scmp.ne.s32.totalorder %s77_s9, %s652_s4  ;;  %p657_p1 = scmp.lt.s32.totalorder %s77_s9, %s77_s9 }
  0x40   :  { %p658_p2 = scmp.lt.s32.totalorder %s652_s4, %s652_s4 }
  0x42   :  { %p659_p3 = por %p658_p2, %p657_p1 }
  0x44   :  { %p660_p4 = pnand %p659_p3, %p653_p0 }
  0x46   :  { %663 = shalt.err (!%p660_p4)
}
  0x47   :  { %s703_s3 = smov [#allocation13]  }
  0x48   :  { %79 = dma.vmem_to_smem %s77_s9, 64, %s703_s3, [#allocation12]  }
  0x49   :  { %686 = dma.done.wait [#allocation4], 512  }
  0x4a   :  { %687 = vsyncadd [#allocation4], 4294966784 }
  0x4b   :  { %688 = dma.done.wait [#allocation6], 32  }
  0x4c   :  { %689 = vsyncadd [#allocation6], 4294967264 }
  0x4d   :  { %690 = dma.done.wait [#allocation9], 144  }
  0x4e   :  { %691 = vsyncadd [#allocation9], 4294967152 }
  0x4f   :  { %692 = dma.done.wait [#allocation12], 80  }
  0x50   :  { %693 = vsyncadd [#allocation12], 4294967216 }
  0x51   :  { %100 = sfence }
  0x52   :  { %s101_s5 = sld [smem:[#allocation7]]  ;;  %s506_s10 = sld [smem:[#allocation7 + $0x1]]  ;;  %v780_v0 = vld [vmem:[#allocation3] sm:$0xff]  ;;  %v782_v1 = vld [vmem:[#allocation3 + $0x8] sm:$0xff]  ;;  %v798_v8 = vld [vmem:[#allocation3 + $0x10] sm:$0xff] }
  0x53   :  { %s507_s11 = sld [smem:[#allocation7 + $0x2]]  ;;  %s508_s12 = sld [smem:[#allocation7 + $0x3]]  ;;  %v800_v9 = vld [vmem:[#allocation3 + $0x18] sm:$0xff] }
  0x54   :  { %s772_s13 = sld [smem:[#allocation7 + $0x4]]  ;;  %s774_s14 = sld [smem:[#allocation7 + $0x5]] }
  0x55   :  { %s776_s15 = sld [smem:[#allocation7 + $0x80]]  ;;  %s778_s16 = sld [smem:[#allocation7 + $0x81]] }
  0x56   :  { %s784_s17 = sld [smem:[#allocation7 + $0x82]]  ;;  %s786_s18 = sld [smem:[#allocation7 + $0x83]] }
  0x57   :  { %s788_s19 = sld [smem:[#allocation7 + $0x84]]  ;;  %s794_s20 = sld [smem:[#allocation8]] }
  0x58   :  { %v176_v2 = vstv %s101_s5  ;;  %v189_v3 = vstv %s506_s10  ;;  %s796_s21 = sld [smem:[#allocation8 + $0x1]]  ;;  %s804_s1 = sld [smem:[#allocation8 + $0x2]] }
  0x59   :  { %v177_v4 = vmul.f32 %v176_v2, %v780_v0  ;;  %v178_v5 = vmul.f32 %v176_v2, %v782_v1  ;;  %v190_v6 = vmul.f32 %v189_v3, %v780_v0  ;;  %v191_v7 = vmul.f32 %v189_v3, %v782_v1  ;;  %s806_s22 = sld [smem:[#allocation8 + $0x3]]  ;;  %s820_s23 = sld [smem:[#allocation8 + $0x4]] }
  0x5a   :  { %v202_v10 = vstv %s507_s11  ;;  %v215_v11 = vstv %s508_s12  ;;  %v228_v12 = vstv %s772_s13  ;;  %v241_v13 = vstv %s774_s14  ;;  %s828_s24 = sld [smem:[#allocation7 + $0x6]]  ;;  %s830_s25 = sld [smem:[#allocation7 + $0x85]] }
  0x5b   :  { %v203_v14 = vmul.f32 %v202_v10, %v780_v0  ;;  %v204_v15 = vmul.f32 %v202_v10, %v782_v1  ;;  %v216_v16 = vmul.f32 %v215_v11, %v780_v0  ;;  %v217_v17 = vmul.f32 %v215_v11, %v782_v1  ;;  %s832_s26 = sld [smem:[#allocation7 + $0x86]]  ;;  %s834_s27 = sld [smem:[#allocation8 + $0x5]] }
  0x5c   :  { %v179_v18 = vstv %s776_s15  ;;  %v192_v19 = vstv %s778_s16  ;;  %v229_v20 = vmul.f32 %v228_v12, %v780_v0  ;;  %v230_v21 = vmul.f32 %v228_v12, %v782_v1  ;;  %s848_s28 = sld [smem:[#allocation7 + $0x7]]  ;;  %s850_s29 = sld [smem:[#allocation8 + $0x6]] }
  0x5d   :  { %v180_v22 = vmul.f32 %v179_v18, %v798_v8  ;;  %v181_v23 = vmul.f32 %v179_v18, %v800_v9  ;;  %v193_v24 = vmul.f32 %v192_v19, %v798_v8  ;;  %v194_v25 = vmul.f32 %v192_v19, %v800_v9  ;;  %s858_s30 = sld [smem:[#allocation7 + $0x87]]  ;;  %s868_s9 = sld [smem:[#allocation10]] }
  0x5e   :  { %v205_v26 = vstv %s784_s17  ;;  %v218_v27 = vstv %s786_s18  ;;  %v231_v28 = vstv %s788_s19  ;;  %v826_v29 = vmul.f32 %v241_v13, %v780_v0  ;;  %s860_s8 = sld [smem:[#allocation8 + $0x7]]  ;;  %s870_s0 = sld [smem:[#allocation10 + $0x80]] }
  0x5f   :  { %v182_v30 = vadd.f32 %v180_v22, %v177_v4  ;;  %v183_v31 = vadd.f32 %v181_v23, %v178_v5  ;;  %v195_v32 = vadd.f32 %v193_v24, %v190_v6  ;;  %v196_v33 = vadd.f32 %v194_v25, %v191_v7  ;;  %s884_s2 = sld [smem:[#allocation10 + $0x100]]  ;;  %s921_s12 = sld [smem:[#allocation10 + $0x1]] }
  0x60   :  { %v184_v34 = vstv %s794_s20  ;;  %v197_v35 = vstv %s796_s21  ;;  %v206_v36 = vmul.f32 %v205_v26, %v798_v8  ;;  %v207_v37 = vmul.f32 %v205_v26, %v800_v9  ;;  %s886_s4 = sld [smem:[#allocation10 + $0x180]]  ;;  %s929_s14 = sld [smem:[#allocation10 + $0x81]] }
  0x61   :  { %v185_v38 = vadd.f32 %v184_v34, %v182_v30  ;;  %v186_v39 = vadd.f32 %v184_v34, %v183_v31  ;;  %v198_v40 = vadd.f32 %v197_v35, %v195_v32  ;;  %v199_v41 = vadd.f32 %v197_v35, %v196_v33  ;;  %s899_s3 = sld [smem:[#allocation10 + $0x200]]  ;;  %s931_s15 = sld [smem:[#allocation10 + $0x101]] }
  0x62   :  { %v208_v42 = vadd.f32 %v206_v36, %v203_v14  ;;  %v209_v43 = vadd.f32 %v207_v37, %v204_v15  ;;  %v210_v44 = vstv %s804_s1  ;;  %v219_v45 = vmul.f32 %v218_v27, %v798_v8  ;;  %s901_s5 = sld [smem:[#allocation10 + $0x280]]  ;;  %s937_s16 = sld [smem:[#allocation10 + $0x181]] }
  0x63   :  { %v842_v46 = vmax.f32 %v185_v38, 0.0  ;;  %v844_v47 = vmax.f32 %v186_v39, 0.0  ;;  %v220_v48 = vmul.f32 %v218_v27, %v800_v9  ;;  %v223_v49 = vstv %s806_s22  ;;  %s907_s10 = sld [smem:[#allocation10 + $0x300]]  ;;  %s939_s17 = sld [smem:[#allocation10 + $0x201]] }
  0x64   :  { %v852_v50 = vmax.f32 %v198_v40, 0.0  ;;  %v854_v51 = vmax.f32 %v199_v41, 0.0  ;;  %v211_v52 = vadd.f32 %v210_v44, %v208_v42  ;;  %v212_v53 = vadd.f32 %v210_v44, %v209_v43  ;;  %s909_s11 = sld [smem:[#allocation10 + $0x380]]  ;;  %s955_s18 = sld [smem:[#allocation10 + $0x281]] }
  0x65   :  { %v221_v54 = vadd.f32 %v219_v45, %v216_v16  ;;  %v222_v55 = vadd.f32 %v220_v48, %v217_v17  ;;  %v232_v56 = vmul.f32 %v231_v28, %v798_v8  ;;  %v233_v57 = vmul.f32 %v231_v28, %v800_v9  ;;  %s923_s13 = sld [smem:[#allocation11]]  ;;  %s957_s19 = sld [smem:[#allocation10 + $0x301]] }
  0x66   :  { %v862_v58 = vmax.f32 %v211_v52, 0.0  ;;  %v864_v59 = vmax.f32 %v212_v53, 0.0  ;;  %v236_v60 = vstv %s820_s23  ;;  %v243_v61 = vmul.f32 %v241_v13, %v782_v1  ;;  %s963_s20 = sld [smem:[#allocation10 + $0x381]]  ;;  %s975_s1 = sld [smem:[#allocation10 + $0x2]] }
  0x67   :  { %v224_v62 = vadd.f32 %v223_v49, %v221_v54  ;;  %v225_v63 = vadd.f32 %v223_v49, %v222_v55  ;;  %v234_v2 = vadd.f32 %v232_v56, %v229_v20  ;;  %v235_v3 = vadd.f32 %v233_v57, %v230_v21  ;;  %s965_s21 = sld [smem:[#allocation11 + $0x1]]  ;;  %s977_s22 = sld [smem:[#allocation10 + $0x82]] }
  0x68   :  { %v244_v4 = vstv %s830_s25  ;;  %v249_v5 = vstv %s834_s27  ;;  %v254_v6 = vstv %s828_s24  ;;  %v257_v7 = vstv %s832_s26  ;;  %s983_s23 = sld [smem:[#allocation10 + $0x102]] }
  0x69   :  { %v876_v10 = vmax.f32 %v224_v62, 0.0  ;;  %v878_v11 = vmax.f32 %v225_v63, 0.0  ;;  %v237_v12 = vadd.f32 %v236_v60, %v234_v2  ;;  %v238_v13 = vadd.f32 %v236_v60, %v235_v3  ;;  %s985_s24 = sld [smem:[#allocation10 + $0x182]] }
  0x6a   :  { %v245_v14 = vmul.f32 %v244_v4, %v798_v8  ;;  %v246_v15 = vmul.f32 %v244_v4, %v800_v9  ;;  %v255_v16 = vmul.f32 %v254_v6, %v780_v0  ;;  %v256_v17 = vmul.f32 %v254_v6, %v782_v1  ;;  %s993_s25 = sld [smem:[#allocation10 + $0x202]] }
  0x6b   :  { %v888_v18 = vmax.f32 %v237_v12, 0.0  ;;  %v890_v19 = vmax.f32 %v238_v13, 0.0  ;;  %v258_v20 = vmul.f32 %v257_v7, %v798_v8  ;;  %v259_v21 = vmul.f32 %v257_v7, %v800_v9  ;;  %s995_s26 = sld [smem:[#allocation10 + $0x282]] }
  0x6c   :  { %v247_v22 = vadd.f32 %v245_v14, %v826_v29  ;;  %v248_v23 = vadd.f32 %v246_v15, %v243_v61  ;;  %v262_v24 = vstv %s850_s29  ;;  %v267_v25 = vstv %s848_s28  ;;  %s1007_s27 = sld [smem:[#allocation10 + $0x302]]  ;;  %s1017_s29 = sld [smem:[#allocation10 + $0x3]] }
  0x6d   :  { %v260_v26 = vadd.f32 %v258_v20, %v255_v16  ;;  %v261_v27 = vadd.f32 %v259_v21, %v256_v17  ;;  %v268_v28 = vmul.f32 %v267_v25, %v780_v0  ;;  %v269_v30 = vmul.f32 %v267_v25, %v782_v1  ;;  %s1009_s28 = sld [smem:[#allocation10 + $0x382]] }
  0x6e   :  { %v250_v31 = vadd.f32 %v249_v5, %v247_v22  ;;  %v251_v32 = vadd.f32 %v249_v5, %v248_v23  ;;  %v270_v33 = vstv %s858_s30  ;;  %v275_v34 = vstv %s860_s8  ;;  %s1019_s30 = sld [smem:[#allocation10 + $0x83]] }
  0x6f   :  { %v263_v29 = vadd.f32 %v262_v24, %v260_v26  ;;  %v264_v35 = vadd.f32 %v262_v24, %v261_v27  ;;  %v271_v36 = vmul.f32 %v270_v33, %v798_v8  ;;  %v272_v37 = vmul.f32 %v270_v33, %v800_v9  ;;  %s1025_s8 = sld [smem:[#allocation10 + $0x103]] }
  0x70   :  { %v911_v0 = vmax.f32 %v250_v31, 0.0  ;;  %v913_v1 = vmax.f32 %v251_v32, 0.0  ;;  %v280_v38 = vstv %s868_s9  ;;  %v283_v39 = vstv %s870_s0  ;;  %s1027_s9 = sld [smem:[#allocation11 + $0x2]]  ;;  %s1035_s0 = sld [smem:[#allocation10 + $0x183]] }
  0x71   :  { %v917_v40 = vmax.f32 %v263_v29, 0.0  ;;  %v919_v41 = vmax.f32 %v264_v35, 0.0  ;;  %v273_v42 = vadd.f32 %v271_v36, %v268_v28  ;;  %v274_v8 = vadd.f32 %v272_v37, %v269_v30 }
  0x72   :  { %v281_v9 = vmul.f32 %v280_v38, %v842_v46  ;;  %v282_v43 = vmul.f32 %v280_v38, %v844_v47  ;;  %v284_v44 = vmul.f32 %v283_v39, %v852_v50  ;;  %v285_v45 = vmul.f32 %v283_v39, %v854_v51 }
  0x73   :  { %v276_v48 = vadd.f32 %v275_v34, %v273_v42  ;;  %v277_v49 = vadd.f32 %v275_v34, %v274_v8  ;;  %v288_v52 = vstv %s884_s2  ;;  %v293_v53 = vstv %s886_s4  ;;  %s1037_s2 = sld [smem:[#allocation10 + $0x203]] }
  0x74   :  { %v286_v54 = vadd.f32 %v284_v44, %v281_v9  ;;  %v287_v55 = vadd.f32 %v285_v45, %v282_v43  ;;  %v289_v56 = vmul.f32 %v288_v52, %v862_v58  ;;  %v290_v57 = vmul.f32 %v288_v52, %v864_v59  ;;  %s1047_s4 = sld [smem:[#allocation10 + $0x283]] }
  0x75   :  { %v941_v60 = vmax.f32 %v276_v48, 0.0  ;;  %v943_v61 = vmax.f32 %v277_v49, 0.0  ;;  %v294_v62 = vmul.f32 %v293_v53, %v876_v10  ;;  %v295_v63 = vmul.f32 %v293_v53, %v878_v11 }
  0x76   :  { %v291_v2 = vadd.f32 %v289_v56, %v286_v54  ;;  %v292_v3 = vadd.f32 %v290_v57, %v287_v55  ;;  %v298_v4 = vstv %s899_s3  ;;  %v303_v5 = vstv %s901_s5  ;;  %s1049_s3 = sld [smem:[#allocation10 + $0x303]] }
  0x77   :  { %v299_v6 = vmul.f32 %v298_v4, %v888_v18  ;;  %v300_v7 = vmul.f32 %v298_v4, %v890_v19  ;;  %v304_v12 = vmul.f32 %v303_v5, %v911_v0  ;;  %v305_v13 = vmul.f32 %v303_v5, %v913_v1  ;;  %s1063_s5 = sld [smem:[#allocation10 + $0x383]] }
  0x78   :  { %v296_v14 = vadd.f32 %v294_v62, %v291_v2  ;;  %v297_v15 = vadd.f32 %v295_v63, %v292_v3  ;;  %v308_v16 = vstv %s907_s10  ;;  %v313_v17 = vstv %s909_s11  ;;  %s1067_s10 = sld [smem:[#allocation13]] }
  0x79   :  { %v309_v20 = vmul.f32 %v308_v16, %v917_v40  ;;  %v310_v21 = vmul.f32 %v308_v16, %v919_v41  ;;  %v314_v22 = vmul.f32 %v313_v17, %v941_v60  ;;  %v315_v23 = vmul.f32 %v313_v17, %v943_v61  ;;  %s1073_s11 = sld [smem:[#allocation13 + $0x80]] }
  0x7a   :  { %v301_v24 = vadd.f32 %v299_v6, %v296_v14  ;;  %v302_v25 = vadd.f32 %v300_v7, %v297_v15  ;;  %v318_v26 = vstv %s923_s13  ;;  %v323_v27 = vstv %s921_s12  ;;  %s1075_s12 = sld [smem:[#allocation13 + $0x100]]  ;;  %s1085_s13 = sld [smem:[#allocation11 + $0x3]] }
  0x7b   :  { %v324_v28 = vmul.f32 %v323_v27, %v842_v46  ;;  %v325_v30 = vmul.f32 %v323_v27, %v844_v47  ;;  %v326_v31 = vstv %s929_s14  ;;  %v331_v32 = vstv %s931_s15  ;;  %s564_s14 = sld [smem:[#allocation13 + $0x180]] }
  0x7c   :  { %v306_v33 = vadd.f32 %v304_v12, %v301_v24  ;;  %v307_v34 = vadd.f32 %v305_v13, %v302_v25  ;;  %v327_v29 = vmul.f32 %v326_v31, %v852_v50  ;;  %v328_v35 = vmul.f32 %v326_v31, %v854_v51 }
  0x7d   :  { %v332_v36 = vmul.f32 %v331_v32, %v862_v58  ;;  %v333_v37 = vmul.f32 %v331_v32, %v864_v59  ;;  %v336_v38 = vstv %s937_s16  ;;  %v341_v39 = vstv %s939_s17  ;;  %s704_s17 = smov [#allocation14]  }
  0x7e   :  { %v311_v42 = vadd.f32 %v309_v20, %v306_v33  ;;  %v312_v8 = vadd.f32 %v310_v21, %v307_v34  ;;  %v329_v9 = vadd.f32 %v327_v29, %v324_v28  ;;  %v330_v43 = vadd.f32 %v328_v35, %v325_v30 }
  0x7f   :  { %v337_v44 = vmul.f32 %v336_v38, %v876_v10  ;;  %v338_v45 = vmul.f32 %v336_v38, %v878_v11  ;;  %v342_v48 = vmul.f32 %v341_v39, %v888_v18  ;;  %v343_v49 = vmul.f32 %v341_v39, %v890_v19 }
  0x80   :  { %v316_v52 = vadd.f32 %v314_v22, %v311_v42  ;;  %v317_v53 = vadd.f32 %v315_v23, %v312_v8  ;;  %v334_v54 = vadd.f32 %v332_v36, %v329_v9  ;;  %v335_v55 = vadd.f32 %v333_v37, %v330_v43 }
  0x81   :  { %v346_v56 = vstv %s955_s18  ;;  %v351_v57 = vstv %s957_s19  ;;  %v356_v2 = vstv %s963_s20  ;;  %v361_v3 = vstv %s965_s21  ;;  %s493_s18 = sshll.u32 %s704_s17, 4  ;;  %s494_s18 = int_to_ptr.vmem [resolvable:$true] %s493_s18 }
  0x82   :  { %v339_v62 = vadd.f32 %v337_v44, %v334_v54  ;;  %v340_v63 = vadd.f32 %v338_v45, %v335_v55  ;;  %v999_v4 = vadd.f32 %v318_v26, %v316_v52  ;;  %v1001_v5 = vadd.f32 %v318_v26, %v317_v53  ;;  %p669_p6 = scmp.lt.s32.totalorder %s494_s18, %s494_s18 }
  0x83   :  { %v347_v6 = vmul.f32 %v346_v56, %v911_v0  ;;  %v348_v7 = vmul.f32 %v346_v56, %v913_v1  ;;  %v352_v14 = vmul.f32 %v351_v57, %v917_v40  ;;  %v353_v15 = vmul.f32 %v351_v57, %v919_v41 }
  0x84   :  { %v344_v12 = vadd.f32 %v342_v48, %v339_v62  ;;  %v345_v13 = vadd.f32 %v343_v49, %v340_v63  ;;  %v357_v16 = vmul.f32 %v356_v2, %v941_v60  ;;  %v358_v17 = vmul.f32 %v356_v2, %v943_v61 }
  0x85   :  { %v366_v20 = vstv %s975_s1  ;;  %v369_v21 = vstv %s977_s22  ;;  %v374_v28 = vstv %s983_s23  ;;  %v379_v30 = vstv %s985_s24 }
  0x86   :  { %v349_v22 = vadd.f32 %v347_v6, %v344_v12  ;;  %v350_v23 = vadd.f32 %v348_v7, %v345_v13  ;;  %v367_v24 = vmul.f32 %v366_v20, %v842_v46  ;;  %v368_v25 = vmul.f32 %v366_v20, %v844_v47 }
  0x87   :  { %v370_v26 = vmul.f32 %v369_v21, %v852_v50  ;;  %v371_v27 = vmul.f32 %v369_v21, %v854_v51  ;;  %v375_v33 = vmul.f32 %v374_v28, %v862_v58  ;;  %v376_v34 = vmul.f32 %v374_v28, %v864_v59 }
  0x88   :  { %v354_v31 = vadd.f32 %v352_v14, %v349_v22  ;;  %v355_v32 = vadd.f32 %v353_v15, %v350_v23  ;;  %v380_v36 = vmul.f32 %v379_v30, %v876_v10  ;;  %v381_v37 = vmul.f32 %v379_v30, %v878_v11 }
  0x89   :  { %v372_v29 = vadd.f32 %v370_v26, %v367_v24  ;;  %v373_v35 = vadd.f32 %v371_v27, %v368_v25  ;;  %v384_v42 = vstv %s993_s25  ;;  %v389_v8 = vstv %s995_s26 }
  0x8a   :  { %v359_v38 = vadd.f32 %v357_v16, %v354_v31  ;;  %v360_v39 = vadd.f32 %v358_v17, %v355_v32  ;;  %v385_v44 = vmul.f32 %v384_v42, %v888_v18  ;;  %v386_v45 = vmul.f32 %v384_v42, %v890_v19 }
  0x8b   :  { %v377_v9 = vadd.f32 %v375_v33, %v372_v29  ;;  %v378_v43 = vadd.f32 %v376_v34, %v373_v35  ;;  %v321_v48 = vmax.f32 %v999_v4, 0.0  ;;  %v322_v49 = vmax.f32 %v1001_v5, 0.0 }
  0x8c   :  { %v390_v52 = vmul.f32 %v389_v8, %v911_v0  ;;  %v391_v53 = vmul.f32 %v389_v8, %v913_v1  ;;  %v394_v56 = vstv %s1007_s27  ;;  %v399_v57 = vstv %s1009_s28 }
  0x8d   :  { %v382_v54 = vadd.f32 %v380_v36, %v377_v9  ;;  %v383_v55 = vadd.f32 %v381_v37, %v378_v43  ;;  %v1051_v62 = vadd.f32 %v361_v3, %v359_v38  ;;  %v1053_v63 = vadd.f32 %v361_v3, %v360_v39 }
  0x8e   :  { %v395_v2 = vmul.f32 %v394_v56, %v917_v40  ;;  %v396_v6 = vmul.f32 %v394_v56, %v919_v41  ;;  %v400_v13 = vmul.f32 %v399_v57, %v941_v60  ;;  %v401_v14 = vmul.f32 %v399_v57, %v943_v61 }
  0x8f   :  { %v387_v7 = vadd.f32 %v385_v44, %v382_v54  ;;  %v388_v12 = vadd.f32 %v386_v45, %v383_v55  ;;  %v404_v15 = vstv %s1027_s9  ;;  %v409_v16 = vstv %s1017_s29 }
  0x90   :  { %v412_v17 = vstv %s1019_s30  ;;  %v417_v20 = vstv %s1025_s8  ;;  %v410_v22 = vmul.f32 %v409_v16, %v842_v46  ;;  %v411_v23 = vmul.f32 %v409_v16, %v844_v47 }
  0x91   :  { %v392_v3 = vadd.f32 %v390_v52, %v387_v7  ;;  %v393_v21 = vadd.f32 %v391_v53, %v388_v12  ;;  %v413_v24 = vmul.f32 %v412_v17, %v852_v50  ;;  %v414_v25 = vmul.f32 %v412_v17, %v854_v51 }
  0x92   :  { %v418_v26 = vmul.f32 %v417_v20, %v862_v58  ;;  %v419_v27 = vmul.f32 %v417_v20, %v864_v59  ;;  %v422_v30 = vstv %s1035_s0  ;;  %v427_v47 = vstv %s1037_s2 }
  0x93   :  { %v397_v28 = vadd.f32 %v395_v2, %v392_v3  ;;  %v398_v46 = vadd.f32 %v396_v6, %v393_v21  ;;  %v415_v31 = vadd.f32 %v413_v24, %v410_v22  ;;  %v416_v32 = vadd.f32 %v414_v25, %v411_v23 }
  0x94   :  { %v423_v50 = vmul.f32 %v422_v30, %v876_v10  ;;  %v424_v51 = vmul.f32 %v422_v30, %v878_v11  ;;  %v428_v59 = vmul.f32 %v427_v47, %v888_v18  ;;  %v429_v34 = vmul.f32 %v427_v47, %v890_v19 }
  0x95   :  { %v402_v33 = vadd.f32 %v400_v13, %v397_v28  ;;  %v403_v58 = vadd.f32 %v401_v14, %v398_v46  ;;  %v420_v29 = vadd.f32 %v418_v26, %v415_v31  ;;  %v421_v35 = vadd.f32 %v419_v27, %v416_v32 }
  0x96   :  { %v432_v36 = vstv %s1047_s4  ;;  %v437_v37 = vstv %s1049_s3  ;;  %v364_v38 = vmax.f32 %v1051_v62, 0.0  ;;  %v365_v39 = vmax.f32 %v1053_v63, 0.0 }
  0x97   :  { %v405_v10 = vadd.f32 %v404_v15, %v402_v33  ;;  %v406_v11 = vadd.f32 %v404_v15, %v403_v58  ;;  %v425_v42 = vadd.f32 %v423_v50, %v420_v29  ;;  %v426_v18 = vadd.f32 %v424_v51, %v421_v35 }
  0x98   :  { %v433_v19 = vmul.f32 %v432_v36, %v911_v0  ;;  %v434_v8 = vmul.f32 %v432_v36, %v913_v1  ;;  %v438_v43 = vmul.f32 %v437_v37, %v917_v40  ;;  %v439_v44 = vmul.f32 %v437_v37, %v919_v41 }
  0x99   :  { %v407_v9 = vmax.f32 %v405_v10, 0.0  ;;  %v442_v45 = vstv %s1063_s5  ;;  %v408_v52 = vmax.f32 %v406_v11, 0.0  ;;  %v430_v53 = vadd.f32 %v428_v59, %v425_v42 }
  0x9a   :  { %v431_v54 = vadd.f32 %v429_v34, %v426_v18  ;;  %v443_v55 = vmul.f32 %v442_v45, %v941_v60  ;;  %v444_v56 = vmul.f32 %v442_v45, %v943_v61  ;;  %v452_v57 = vstv %s1067_s10 }
  0x9b   :  { %v455_v62 = vstv %s1073_s11  ;;  %v460_v0 = vstv %s1075_s12  ;;  %v435_v63 = vadd.f32 %v433_v19, %v430_v53  ;;  %v453_v40 = vmul.f32 %v452_v57, %v321_v48 }
  0x9c   :  { %v436_v1 = vadd.f32 %v434_v8, %v431_v54  ;;  %v454_v41 = vmul.f32 %v452_v57, %v322_v49  ;;  %v456_v2 = vmul.f32 %v455_v62, %v364_v38  ;;  %v457_v6 = vmul.f32 %v455_v62, %v365_v39 }
  0x9d   :  { %v440_v7 = vadd.f32 %v438_v43, %v435_v63  ;;  %v447_v13 = vstv %s1085_s13  ;;  %v461_v60 = vmul.f32 %v460_v0, %v407_v9  ;;  %v462_v14 = vmul.f32 %v460_v0, %v408_v52 }
  0x9e   :  { %v441_v12 = vadd.f32 %v439_v44, %v436_v1  ;;  %v458_v16 = vadd.f32 %v456_v2, %v453_v40  ;;  %v459_v17 = vadd.f32 %v457_v6, %v454_v41  ;;  %v465_v21 = vstv %s564_s14 }
  0x9f   :  { %v445_v15 = vadd.f32 %v443_v55, %v440_v7  ;;  %v470_v24 = vstv %s1125_s6  ;;  %s664_s6 = scalar_lea.vmem %s494_s18, 256 }
  0xa0   :  { %v446_v61 = vadd.f32 %v444_v56, %v441_v12  ;;  %v463_v48 = vadd.f32 %v461_v60, %v458_v16  ;;  %v464_v23 = vadd.f32 %v462_v14, %v459_v17  ;;  %p665_p5 = scmp.ne.s32.totalorder %s494_s18, %s664_s6  ;;  %p670_p7 = scmp.lt.s32.totalorder %s664_s6, %s664_s6 }
  0xa1   :  { %v448_v20 = vadd.f32 %v447_v13, %v445_v15 }
  0xa2   :  { %v449_v3 = vadd.f32 %v447_v13, %v446_v61  ;;  %p671_p8 = por %p670_p7, %p669_p6 }
  0xa3   :  { %v450_v22 = vmax.f32 %v448_v20, 0.0 }
  0xa4   :  { %v451_v4 = vmax.f32 %v449_v3, 0.0  ;;  %p672_p9 = pnand %p671_p8, %p665_p5 }
  0xa5   :  { %v466_v5 = vmul.f32 %v465_v21, %v450_v22 }
  0xa6   :  { %v467_v49 = vmul.f32 %v465_v21, %v451_v4 }
  0xa7   :  { %v468_v25 = vadd.f32 %v466_v5, %v463_v48 }
  0xa8   :  { %v469_v26 = vadd.f32 %v467_v49, %v464_v23 }
  0xa9   :  { %v471_v27 = vadd.f32 %v470_v24, %v468_v25 }
  0xaa   :  { %v472_v28 = vadd.f32 %v470_v24, %v469_v26 }
  0xab   :  { %v473_v46 = vsub.f32 0.0, %v471_v27 }
  0xac   :  { %v474_v30 = vsub.f32 0.0, %v472_v28 }
  0xad   :  { %v475_v47 = vmul.f32 1.442695, %v473_v46 }
  0xae   :  { %v477_v31 = vmul.f32 1.442695, %v474_v30 }
  0xaf   :  { %574 = vpow2.f32 %v475_v47 }
  0xb0   :  { %576 = vpow2.f32 %v477_v31 }
  0xb9   :  { %v575_v32 = vpop.eup %574 }
  0xba   :  { %v577_v50 = vpop.eup %576  ;;  %v479_v51 = vadd.f32 1.0, %v575_v32 }
  0xbb   :  { %v480_v33 = vadd.f32 1.0, %v577_v50 }
  0xbc   :  { %578 = vrcp.f32 %v479_v51 }
  0xbd   :  { %580 = vrcp.f32 %v480_v33 }
  0xc6   :  { %v579_v58 = vpop.eup %578 }
  0xc7   :  { %v581_v59 = vpop.eup %580  ;;  %485 = vst [vmem:[#allocation14] sm:$0xff] %v579_v58 }
  0xc8   :  { %486 = vst [vmem:[#allocation14 + $0x8] sm:$0xff] %v581_v59 }
  0xc9   :  { %675 = shalt.err (!%p672_p9)
}
  0xca   :  { %s676_s21 = scalar_lea.hbm %s1126_s7, 256 }
  0xcb   :  { %p677_p10 = scmp.ne.s32.totalorder %s1126_s7, %s676_s21  ;;  %p680_p11 = scmp.lt.u32.totalorder %s676_s21, %s1126_s7 }
  0xcd   :  { %p682_p12 = pnand %p680_p11, %p677_p10 }
  0xcf   :  { %685 = shalt.err (!%p682_p12)
}
  0xd0   :  { %496 = dma.vmem_to_hbm [thread:$0]  %s494_s18, 256, %s1126_s7, [#allocation5]  }
  0xd1   :  { %694 = dma.done.wait [#allocation5], 256  }
  0xd2   :  { %695 = vsyncadd [#allocation5], 4294967040 }
  0xd3   :  { %500 = vsyncpa [#allocation4], 1 }
  0xd4   :  { %501 = vsyncpa [#allocation5], 1 }
  0xd5   :  { %502 = vsyncpa [#allocation6], 1 }
  0xd6   :  { %503 = vsyncpa [#allocation9], 1 }
  0xd7   :  { %504 = vsyncpa [#allocation12], 1 }

</bundles_post_ra>
